<compile_context>
chip_gen: v7x
topology: tpu7x:2x2x1
jax: 0.10.0
libtpu: 0.0.40
codegen_flags: <defaults>
</compile_context>

<pallas_src>
from functools import partial

import jax
import jax.numpy as jnp
from jax.experimental import pallas as pl
from jax.experimental.pallas import tpu as pltpu


HIDDEN = 256
OUT = 2


def _round_up(x, m):
    return (x + m - 1) // m * m


def decoder_kernel(x_ref,
                   w0_ref, b0_ref,
                   w1_ref, b1_ref,
                   w2_ref, b2_ref,
                   w3_ref, b3_ref,
                   o_ref,
                   *, compute_dtype):
    """Whole 4-layer MLP for one batch tile, entirely in VMEM.

    Matmuls run in `compute_dtype` (bf16) with f32 accumulation; the bias add
    and ReLU are done in f32 and re-cast to bf16 between layers.
    """
    x = x_ref[...]

    h = jnp.dot(x, w0_ref[...], preferred_element_type=jnp.float32) + b0_ref[...]
    h = jnp.maximum(h, 0.0).astype(compute_dtype)

    h = jnp.dot(h, w1_ref[...], preferred_element_type=jnp.float32) + b1_ref[...]
    h = jnp.maximum(h, 0.0).astype(compute_dtype)

    h = jnp.dot(h, w2_ref[...], preferred_element_type=jnp.float32) + b2_ref[...]
    h = jnp.maximum(h, 0.0).astype(compute_dtype)

    out = jnp.dot(h, w3_ref[...], preferred_element_type=jnp.float32) + b3_ref[...]
    o_ref[...] = out.astype(o_ref.dtype)


def decoder_forward(embed, params, *, block_m=256, compute_dtype=jnp.bfloat16):
    """embed: [B, emb_size] float32.  params: dict of (w [in,out], b [1,out])."""
    B, E = embed.shape

    (w0, b0), (w1, b1), (w2, b2), (w3, b3) = (
        params["l0"], params["l1"], params["l2"], params["l3"])

    # --- pad contraction dim of layer 0 to a multiple of 128 (full MXU depth) ---
    E_pad = _round_up(E, 128)
    if E_pad != E:
        embed = jnp.pad(embed, ((0, 0), (0, E_pad - E)))
        w0 = jnp.pad(w0, ((0, E_pad - E), (0, 0)))   # zero rows -> exact result

    # --- choose batch tile: large for throughput, shrink for tiny batches ---
    bm = block_m if B >= block_m else _round_up(B, 8)
    B_pad = _round_up(B, bm)
    if B_pad != B:
        embed = jnp.pad(embed, ((0, B_pad - B), (0, 0)))

    # --- bf16 matmul operands (f32 accumulation inside the kernel) ---
    x = embed.astype(compute_dtype)
    w0c = w0.astype(compute_dtype)
    w1c = w1.astype(compute_dtype)
    w2c = w2.astype(compute_dtype)
    w3c = w3.astype(compute_dtype)
    # biases stay f32; added after f32 accumulation.

    grid = (B_pad // bm,)

    def full_spec(shape):
        return pl.BlockSpec(shape, lambda i: (0,) * len(shape))

    flops = 2 * B_pad * (E_pad * HIDDEN + 2 * HIDDEN * HIDDEN + HIDDEN * OUT)
    bytes_accessed = (
        B_pad * E_pad * 2                                   # x (bf16)
        + (E_pad * HIDDEN + 2 * HIDDEN * HIDDEN + HIDDEN * OUT) * 2  # weights (bf16)
        + (3 * HIDDEN + OUT) * 4                            # biases (f32)
        + B_pad * OUT * 4                                   # output (f32)
    )

    kernel = partial(decoder_kernel, compute_dtype=compute_dtype)

    out = pl.pallas_call(
        kernel,
        out_shape=jax.ShapeDtypeStruct((B_pad, OUT), jnp.float32),
        grid=grid,
        in_specs=[
            pl.BlockSpec((bm, E_pad), lambda i: (i, 0)),    # x tile (batch tiled)
            full_spec(w0c.shape), full_spec(b0.shape),
            full_spec(w1c.shape), full_spec(b1.shape),
            full_spec(w2c.shape), full_spec(b2.shape),
            full_spec(w3c.shape), full_spec(b3.shape),
        ],
        # NOTE: OUT=2 output tile is lane-sparse (masked partial stores); bytes
        # are tiny, so we keep the exact (B, 2) shape rather than padding.
        out_specs=pl.BlockSpec((bm, OUT), lambda i: (i, 0)),
        compiler_params=pltpu.CompilerParams(
            dimension_semantics=("parallel",)),
        cost_estimate=pl.CostEstimate(
            flops=int(flops), transcendentals=0,
            bytes_accessed=int(bytes_accessed)),
    )(x, w0c, b0, w1c, b1, w2c, b2, w3c, b3)

    return out[:B] if B_pad != B else out


def init_params(key, emb_size):
    """Deterministic init mirroring nn.Linear shapes.

    torch Linear weight is [out, in]; we store the transpose [in, out] so the
    kernel can do x @ W without an in-kernel transpose.
    """
    dims = [(emb_size, HIDDEN), (HIDDEN, HIDDEN), (HIDDEN, HIDDEN), (HIDDEN, OUT)]
    params = {}
    for idx, (d_in, d_out) in enumerate(dims):
        key, kw, kb = jax.random.split(key, 3)
        bound = 1.0 / jnp.sqrt(d_in)
        w = jax.random.uniform(kw, (d_in, d_out), jnp.float32, -bound, bound)
        b = jax.random.uniform(kb, (1, d_out), jnp.float32, -bound, bound)
        params[f"l{idx}"] = (w, b)
    return params


def reference_forward(embed, params, compute_dtype=jnp.bfloat16):
    """Plain-JAX reference mirroring the kernel's bf16-operand / f32-accum math."""
    h = embed.astype(compute_dtype)
    for name in ("l0", "l1", "l2"):
        w, b = params[name]
        h = jnp.dot(h, w.astype(compute_dtype),
                    preferred_element_type=jnp.float32) + b
        h = jnp.maximum(h, 0.0).astype(compute_dtype)
    w, b = params["l3"]
    return jnp.dot(h, w.astype(compute_dtype),
                   preferred_element_type=jnp.float32) + b


def reference_forward_f32(embed, params):
    """Full-precision reference of the original torch forward."""
    h = embed
    for name in ("l0", "l1", "l2"):
        w, b = params[name]
        h = jnp.maximum(h @ w + b, 0.0)
    w, b = params["l3"]
    return h @ w + b


if __name__ == "__main__":
    key = jax.random.PRNGKey(0)
    k_x, k_p = jax.random.split(key)

    batch, emb_size = 8, 32
    embed = jax.random.normal(k_x, (batch, emb_size), jnp.float32)
    params = init_params(k_p, emb_size)

    out = decoder_forward(embed, params)
    out = jax.block_until_ready(out)
    assert out.shape == (batch, OUT)

    # Exact-quantization reference (bf16 operands, f32 accumulation).
    ref_bf16 = reference_forward(embed, params)
    assert jnp.allclose(out, ref_bf16, atol=2e-3, rtol=2e-3), \
        "mismatch vs bf16 reference"

    # Sanity check vs the full f32 torch-equivalent forward (loose tolerance
    # for the bf16 operand quantization).
    ref_f32 = reference_forward_f32(embed, params)
    assert jnp.allclose(out, ref_f32, atol=5e-2, rtol=5e-2), \
        "mismatch vs f32 reference"

    print("KERNEL_OK")
</pallas_src>

<mosaic_0001>
module attributes {stable_mosaic.version = 11 : i64} {
  func.func @decoder_kernel(%arg0: i32, %arg1: memref<8x128xbf16, #tpu.memory_space<vmem>>, %arg2: memref<128x256xbf16, #tpu.memory_space<vmem>>, %arg3: memref<1x256xf32, #tpu.memory_space<vmem>>, %arg4: memref<256x256xbf16, #tpu.memory_space<vmem>>, %arg5: memref<1x256xf32, #tpu.memory_space<vmem>>, %arg6: memref<256x256xbf16, #tpu.memory_space<vmem>>, %arg7: memref<1x256xf32, #tpu.memory_space<vmem>>, %arg8: memref<256x2xbf16, #tpu.memory_space<vmem>>, %arg9: memref<1x2xf32, #tpu.memory_space<vmem>>, %arg10: memref<8x2xf32, #tpu.memory_space<vmem>>) attributes {dimension_semantics = [#tpu.dimension_semantics<parallel>], iteration_bounds = array<i64: 1>, scalar_prefetch = 0 : i64, scratch_operands = 0 : i64, tpu.core_type = #tpu.core_type<tc>, window_params = [{transform_indices = @transform_0, window_bounds = array<i64: 8, 128>}, {pipeline_mode = #tpu.pipeline_mode<synchronous>, transform_indices = @transform_1, window_bounds = array<i64: 128, 256>}, {pipeline_mode = #tpu.pipeline_mode<synchronous>, transform_indices = @transform_2, window_bounds = array<i64: 1, 256>}, {pipeline_mode = #tpu.pipeline_mode<synchronous>, transform_indices = @transform_3, window_bounds = array<i64: 256, 256>}, {pipeline_mode = #tpu.pipeline_mode<synchronous>, transform_indices = @transform_4, window_bounds = array<i64: 1, 256>}, {pipeline_mode = #tpu.pipeline_mode<synchronous>, transform_indices = @transform_5, window_bounds = array<i64: 256, 256>}, {pipeline_mode = #tpu.pipeline_mode<synchronous>, transform_indices = @transform_6, window_bounds = array<i64: 1, 256>}, {pipeline_mode = #tpu.pipeline_mode<synchronous>, transform_indices = @transform_7, window_bounds = array<i64: 256, 2>}, {pipeline_mode = #tpu.pipeline_mode<synchronous>, transform_indices = @transform_8, window_bounds = array<i64: 1, 2>}, {transform_indices = @transform_9, window_bounds = array<i64: 8, 2>}]} {
    %c0 = arith.constant 0 : index
    %c0_0 = arith.constant 0 : index
    %0 = vector.load %arg1[%c0, %c0_0] : memref<8x128xbf16, #tpu.memory_space<vmem>>, vector<8x128xbf16>
    %c0_1 = arith.constant 0 : index
    %c0_2 = arith.constant 0 : index
    %1 = vector.load %arg2[%c0_1, %c0_2] : memref<128x256xbf16, #tpu.memory_space<vmem>>, vector<128x256xbf16>
    %cst = arith.constant dense<0.000000e+00> : vector<8x256xf32>
    %2 = tpu.matmul %0, %1, %cst {dimension_numbers = #tpu.dot_dimension_numbers<[1], [0], [0], [1], [0, 0, 1, 1], [], []>} : vector<8x128xbf16>, vector<128x256xbf16>, vector<8x256xf32> -> vector<8x256xf32>
    %c0_3 = arith.constant 0 : index
    %c0_4 = arith.constant 0 : index
    %3 = vector.load %arg3[%c0_3, %c0_4] : memref<1x256xf32, #tpu.memory_space<vmem>>, vector<1x256xf32>
    %4 = vector.broadcast %3 : vector<1x256xf32> to vector<8x256xf32>
    %5 = arith.addf %2, %4 : vector<8x256xf32>
    %cst_5 = arith.constant 0.000000e+00 : f32
    %6 = vector.broadcast %cst_5 : f32 to vector<8x256xf32>
    %7 = arith.maximumf %5, %6 : vector<8x256xf32>
    %8 = arith.truncf %7 : vector<8x256xf32> to vector<8x256xbf16>
    %c0_6 = arith.constant 0 : index
    %c0_7 = arith.constant 0 : index
    %9 = vector.load %arg4[%c0_6, %c0_7] : memref<256x256xbf16, #tpu.memory_space<vmem>>, vector<256x256xbf16>
    %cst_8 = arith.constant dense<0.000000e+00> : vector<8x256xf32>
    %10 = tpu.matmul %8, %9, %cst_8 {dimension_numbers = #tpu.dot_dimension_numbers<[1], [0], [0], [1], [0, 0, 1, 1], [], []>} : vector<8x256xbf16>, vector<256x256xbf16>, vector<8x256xf32> -> vector<8x256xf32>
    %c0_9 = arith.constant 0 : index
    %c0_10 = arith.constant 0 : index
    %11 = vector.load %arg5[%c0_9, %c0_10] : memref<1x256xf32, #tpu.memory_space<vmem>>, vector<1x256xf32>
    %12 = vector.broadcast %11 : vector<1x256xf32> to vector<8x256xf32>
    %13 = arith.addf %10, %12 : vector<8x256xf32>
    %cst_11 = arith.constant 0.000000e+00 : f32
    %14 = vector.broadcast %cst_11 : f32 to vector<8x256xf32>
    %15 = arith.maximumf %13, %14 : vector<8x256xf32>
    %16 = arith.truncf %15 : vector<8x256xf32> to vector<8x256xbf16>
    %c0_12 = arith.constant 0 : index
    %c0_13 = arith.constant 0 : index
    %17 = vector.load %arg6[%c0_12, %c0_13] : memref<256x256xbf16, #tpu.memory_space<vmem>>, vector<256x256xbf16>
    %cst_14 = arith.constant dense<0.000000e+00> : vector<8x256xf32>
    %18 = tpu.matmul %16, %17, %cst_14 {dimension_numbers = #tpu.dot_dimension_numbers<[1], [0], [0], [1], [0, 0, 1, 1], [], []>} : vector<8x256xbf16>, vector<256x256xbf16>, vector<8x256xf32> -> vector<8x256xf32>
    %c0_15 = arith.constant 0 : index
    %c0_16 = arith.constant 0 : index
    %19 = vector.load %arg7[%c0_15, %c0_16] : memref<1x256xf32, #tpu.memory_space<vmem>>, vector<1x256xf32>
    %20 = vector.broadcast %19 : vector<1x256xf32> to vector<8x256xf32>
    %21 = arith.addf %18, %20 : vector<8x256xf32>
    %cst_17 = arith.constant 0.000000e+00 : f32
    %22 = vector.broadcast %cst_17 : f32 to vector<8x256xf32>
    %23 = arith.maximumf %21, %22 : vector<8x256xf32>
    %24 = arith.truncf %23 : vector<8x256xf32> to vector<8x256xbf16>
    %c0_18 = arith.constant 0 : index
    %c0_19 = arith.constant 0 : index
    %25 = vector.load %arg8[%c0_18, %c0_19] : memref<256x2xbf16, #tpu.memory_space<vmem>>, vector<256x2xbf16>
    %cst_20 = arith.constant dense<0.000000e+00> : vector<8x2xf32>
    %26 = tpu.matmul %24, %25, %cst_20 {dimension_numbers = #tpu.dot_dimension_numbers<[1], [0], [0], [1], [0, 0, 1, 1], [], []>} : vector<8x256xbf16>, vector<256x2xbf16>, vector<8x2xf32> -> vector<8x2xf32>
    %c0_21 = arith.constant 0 : index
    %c0_22 = arith.constant 0 : index
    %27 = vector.load %arg9[%c0_21, %c0_22] : memref<1x2xf32, #tpu.memory_space<vmem>>, vector<1x2xf32>
    %28 = vector.broadcast %27 : vector<1x2xf32> to vector<8x2xf32>
    %29 = arith.addf %26, %28 : vector<8x2xf32>
    %c0_23 = arith.constant 0 : index
    %c0_24 = arith.constant 0 : index
    %30 = vector.load %arg10[%c0_23, %c0_24] : memref<8x2xf32, #tpu.memory_space<vmem>>, vector<8x2xf32>
    tpu.vector_store %arg10[%c0_23, %c0_24], %29 {strides = array<i32>} : memref<8x2xf32, #tpu.memory_space<vmem>>, vector<8x2xf32>,
    return
  }
  func.func @transform_0(%arg0: i32) -> (i32, i32) {
    %c0_i32 = arith.constant 0 : i32
    %c0_i32_0 = arith.constant 0 : i32
    return %arg0, %c0_i32 : i32, i32
  }
  func.func @transform_1(%arg0: i32) -> (i32, i32) {
    %c0_i32 = arith.constant 0 : i32
    %c0_i32_0 = arith.constant 0 : i32
    %c0_i32_1 = arith.constant 0 : i32
    return %c0_i32, %c0_i32_0 : i32, i32
  }
  func.func @transform_2(%arg0: i32) -> (i32, i32) {
    %c0_i32 = arith.constant 0 : i32
    %c0_i32_0 = arith.constant 0 : i32
    %c0_i32_1 = arith.constant 0 : i32
    return %c0_i32, %c0_i32_0 : i32, i32
  }
  func.func @transform_3(%arg0: i32) -> (i32, i32) {
    %c0_i32 = arith.constant 0 : i32
    %c0_i32_0 = arith.constant 0 : i32
    %c0_i32_1 = arith.constant 0 : i32
    return %c0_i32, %c0_i32_0 : i32, i32
  }
  func.func @transform_4(%arg0: i32) -> (i32, i32) {
    %c0_i32 = arith.constant 0 : i32
    %c0_i32_0 = arith.constant 0 : i32
    %c0_i32_1 = arith.constant 0 : i32
    return %c0_i32, %c0_i32_0 : i32, i32
  }
  func.func @transform_5(%arg0: i32) -> (i32, i32) {
    %c0_i32 = arith.constant 0 : i32
    %c0_i32_0 = arith.constant 0 : i32
    %c0_i32_1 = arith.constant 0 : i32
    return %c0_i32, %c0_i32_0 : i32, i32
  }
  func.func @transform_6(%arg0: i32) -> (i32, i32) {
    %c0_i32 = arith.constant 0 : i32
    %c0_i32_0 = arith.constant 0 : i32
    %c0_i32_1 = arith.constant 0 : i32
    return %c0_i32, %c0_i32_0 : i32, i32
  }
  func.func @transform_7(%arg0: i32) -> (i32, i32) {
    %c0_i32 = arith.constant 0 : i32
    %c0_i32_0 = arith.constant 0 : i32
    %c0_i32_1 = arith.constant 0 : i32
    return %c0_i32, %c0_i32_0 : i32, i32
  }
  func.func @transform_8(%arg0: i32) -> (i32, i32) {
    %c0_i32 = arith.constant 0 : i32
    %c0_i32_0 = arith.constant 0 : i32
    %c0_i32_1 = arith.constant 0 : i32
    return %c0_i32, %c0_i32_0 : i32, i32
  }
  func.func @transform_9(%arg0: i32) -> (i32, i32) {
    %c0_i32 = arith.constant 0 : i32
    %c0_i32_0 = arith.constant 0 : i32
    return %arg0, %c0_i32 : i32, i32
  }
}

</mosaic_0001>

<bundles_post_ra>
// kernel: tpu_custom_call.1
= control target key start
LH: loop header
LB: loop body
LE: loop exit
PB: predicated region body
PF: predicated region fallthrough
CT: control target
= control target key end

     0   :  { %14 = vsyncpa [#allocation3], 0  ;;  %s1407_s0 = inlined_call_operand.vmem [shape: bf16[8,128], index: 0, kind: input, shape index: {}]   ;;  %s1408_s1 = inlined_call_operand.vmem [shape: bf16[128,256], index: 1, kind: input, shape index: {}]   ;;  %s1409_s2 = inlined_call_operand.vmem [shape: f32[1,256], index: 2, kind: input, shape index: {}]   ;;  %s1410_s3 = inlined_call_operand.hbm [shape: bf16[256,256], index: 3, kind: input, shape index: {}]   ;;  %s1411_s4 = inlined_call_operand.vmem [shape: f32[1,256], index: 4, kind: input, shape index: {}]   ;;  %s1412_s5 = inlined_call_operand.hbm [shape: bf16[256,256], index: 5, kind: input, shape index: {}]   ;;  %s1413_s6 = inlined_call_operand.vmem [shape: f32[1,256], index: 6, kind: input, shape index: {}]   ;;  %s1414_s7 = inlined_call_operand.vmem [shape: bf16[256,2], index: 7, kind: input, shape index: {}]   ;;  %s1415_s8 = inlined_call_operand.vmem [shape: f32[1,2], index: 8, kind: input, shape index: {}]   ;;  %s1416_s9 = inlined_call_operand.vmem [shape: f32[8,2], index: 9, kind: output, shape index: {}]  }
   0x1   :  { %15 = vsyncpa [#allocation5], 0  ;;  %s1204_s30 = smov [#allocation2]   ;;  %s1156_s13 = scalar_lea.hbm %s1410_s3, 4096 }
   0x2   :  { %s27_s10 = sshll.u32 %s1204_s30, 4  ;;  %p1157_p0 = scmp.ne.s32.totalorder %s1410_s3, %s1156_s13  ;;  %s28_s10 = int_to_ptr.vmem [resolvable:$true] %s27_s10 }
   0x3   :  { %p1160_p1 = scmp.lt.u32.totalorder %s1156_s13, %s1410_s3 }
   0x5   :  { %p1162_p2 = pnand %p1160_p1, %p1157_p0 }
   0x7   :  { %1165 = shalt.err (!%p1162_p2)
}
   0x8   :  { %s1166_s18 = scalar_lea.vmem %s28_s10, 4096  ;;  %p1171_p4 = scmp.lt.s32.totalorder %s28_s10, %s28_s10 }
   0x9   :  { %p1167_p3 = scmp.ne.s32.totalorder %s28_s10, %s1166_s18  ;;  %p1172_p5 = scmp.lt.s32.totalorder %s1166_s18, %s1166_s18 }
   0xb   :  { %p1173_p6 = por %p1172_p5, %p1171_p4 }
   0xd   :  { %p1174_p7 = pnand %p1173_p6, %p1167_p3 }
   0xf   :  { %1177 = shalt.err (!%p1174_p7)
}
  0x10   :  { %s1205_s19 = smov 128   ;;  %s1206_s20 = smov 8  }
  0x11   :  { %33 = dma.hbm_to_vmem [thread:$0]  %s1410_s3, 4096, %s28_s10, [#allocation3], %s1205_s19, %s1205_s19, %s1206_s20  }
  0x12   :  { %s1207_s23 = smov [#allocation4]   ;;  %s1178_s27 = scalar_lea.hbm %s1412_s5, 4096 }
  0x13   :  { %s41_s24 = sshll.u32 %s1207_s23, 4  ;;  %p1179_p8 = scmp.ne.s32.totalorder %s1412_s5, %s1178_s27  ;;  %s42_s24 = int_to_ptr.vmem [resolvable:$true] %s41_s24 }
  0x14   :  { %p1182_p9 = scmp.lt.u32.totalorder %s1178_s27, %s1412_s5 }
  0x16   :  { %p1184_p10 = pnand %p1182_p9, %p1179_p8 }
  0x18   :  { %1187 = shalt.err (!%p1184_p10)
}
  0x19   :  { %s1188_s12 = scalar_lea.vmem %s42_s24, 4096  ;;  %p1193_p12 = scmp.lt.s32.totalorder %s42_s24, %s42_s24 }
  0x1a   :  { %p1189_p11 = scmp.ne.s32.totalorder %s42_s24, %s1188_s12  ;;  %p1194_p13 = scmp.lt.s32.totalorder %s1188_s12, %s1188_s12 }
  0x1c   :  { %p1195_p0 = por %p1194_p13, %p1193_p12 }
  0x1e   :  { %p1196_p1 = pnand %p1195_p0, %p1189_p11 }
  0x20   :  { %1199 = shalt.err (!%p1196_p1)
}
  0x21   :  { %47 = dma.hbm_to_vmem [thread:$0]  %s1412_s5, 4096, %s42_s24, [#allocation5], %s1205_s19, %s1205_s19, %s1206_s20  }
  0x22   :  { %1200 = dma.done.wait [#allocation3], 4096  }
  0x23   :  { %1201 = vsyncadd [#allocation3], 4294963200 }
  0x24   :  { %1202 = dma.done.wait [#allocation5], 4096  }
  0x25   :  { %1203 = vsyncadd [#allocation5], 4294963200  ;;  %v1208_v0 = vmov 0   ;;  %v1020_v1 = vld [vmem:[%s1408_s1 + $0x4] ss:$8 sps:$4 sm:$0xff]   ;;  %vm888_vm0 = vcmask 15360  }
  0x26   :  { %202 = vmatprep.mubr.bf16.mxu0 %v1208_v0  ;;  %v1022_v2 = vld [vmem:[%s1408_s1] ss:$8 sps:$4 sm:$0xff]   ;;  %170 = vmatprep.subr.bf16.mxu0 %v1020_v1  ;;  %v1023_v3 = vld [vmem:[%s1408_s1 + $0x14] ss:$8 sps:$4 sm:$0xff]   ;;  %v1025_v4 = vld [vmem:[%s1408_s1 + $0x10] ss:$8 sps:$4 sm:$0xff]  }
  0x27   :  { %171 = vmatpush1.bf16.msra.mxu0 %v1022_v2  ;;  %v1026_v5 = vld [vmem:[%s1408_s1 + $0x24] ss:$8 sps:$4 sm:$0xff]   ;;  %v1028_v6 = vld [vmem:[%s1408_s1 + $0x20] ss:$8 sps:$4 sm:$0xff]   ;;  %v1029_v7 = vld [vmem:[%s1408_s1 + $0x34] ss:$8 sps:$4 sm:$0xff]  }
  0x28   :  { %172 = vmatprep.subr.bf16.mxu0 %v1023_v3  ;;  %v1031_v8 = vld [vmem:[%s1408_s1 + $0x30] ss:$8 sps:$4 sm:$0xff]   ;;  %v1032_v9 = vld [vmem:[%s1408_s1 + $0x44] ss:$8 sps:$4 sm:$0xff]   ;;  %v1046_v11 = vld [vmem:[#allocation2] ss:$8 sps:$4 sm:$0xff]  }
  0x29   :  { %v1044_v10 = vld [vmem:[#allocation2 + $0x4] ss:$8 sps:$4 sm:$0xff]   ;;  %v1047_v12 = vld [vmem:[#allocation2 + $0x14] ss:$8 sps:$4 sm:$0xff]   ;;  %v1034_v13 = vld [vmem:[%s1408_s1 + $0x40] ss:$8 sps:$4 sm:$0xff]  }
  0x2a   :  { %419 = vmatprep.subr.bf16.mxu1 %v1044_v10  ;;  %v1049_v14 = vld [vmem:[#allocation2 + $0x10] ss:$8 sps:$4 sm:$0xff]   ;;  %v1050_v15 = vld [vmem:[#allocation2 + $0x24] ss:$8 sps:$4 sm:$0xff]   ;;  %v1035_v16 = vld [vmem:[%s1408_s1 + $0x54] ss:$8 sps:$4 sm:$0xff]  }
  0x2b   :  { %173 = vmatpush1.bf16.msra.mxu0 %v1025_v4  ;;  %420 = vmatpush1.bf16.msra.mxu1 %v1046_v11  ;;  %v1037_v17 = vld [vmem:[%s1408_s1 + $0x50] ss:$8 sps:$4 sm:$0xff]   ;;  %v1052_v18 = vld [vmem:[#allocation2 + $0x20] ss:$8 sps:$4 sm:$0xff]   ;;  %v1053_v19 = vld [vmem:[#allocation2 + $0x34] ss:$8 sps:$4 sm:$0xff]  }
  0x2c   :  { %174 = vmatprep.subr.bf16.mxu0 %v1026_v5  ;;  %421 = vmatprep.subr.bf16.mxu1 %v1047_v12  ;;  %v1038_v20 = vld [vmem:[%s1408_s1 + $0x64] ss:$8 sps:$4 sm:$0xff]   ;;  %v1040_v21 = vld [vmem:[%s1408_s1 + $0x60] ss:$8 sps:$4 sm:$0xff]   ;;  %v1055_v22 = vld [vmem:[#allocation2 + $0x30] ss:$8 sps:$4 sm:$0xff]  }
  0x2d   :  { %v1056_v23 = vld [vmem:[#allocation2 + $0x44] ss:$8 sps:$4 sm:$0xff]   ;;  %v1041_v24 = vld [vmem:[%s1408_s1 + $0x74] ss:$8 sps:$4 sm:$0xff]   ;;  %v1043_v25 = vld [vmem:[%s1408_s1 + $0x70] ss:$8 sps:$4 sm:$0xff]  }
  0x2e   :  { %v1058_v26 = vld [vmem:[#allocation2 + $0x40] ss:$8 sps:$4 sm:$0xff]   ;;  %v1059_v27 = vld [vmem:[#allocation2 + $0x54] ss:$8 sps:$4 sm:$0xff]   ;;  %v1061_v29 = vld [vmem:[#allocation2 + $0x50] ss:$8 sps:$4 sm:$0xff]  }
  0x2f   :  { %175 = vmatpush1.bf16.msra.mxu0 %v1028_v6  ;;  %422 = vmatpush1.bf16.msra.mxu1 %v1049_v14  ;;  %v61_v28 = vld [vmem:[%s1407_s0] sm:$0xf]  ;;  %v1062_v30 = vld [vmem:[#allocation2 + $0x64] ss:$8 sps:$4 sm:$0xff]   ;;  %v1065_v32 = vld [vmem:[#allocation2 + $0x74] ss:$8 sps:$4 sm:$0xff]   ;;  %v80_v14 = vlaneseq }
  0x30   :  { %176 = vmatprep.subr.bf16.mxu0 %v1029_v7  ;;  %423 = vmatprep.subr.bf16.mxu1 %v1050_v15  ;;  %v1064_v31 = vld [vmem:[#allocation2 + $0x60] ss:$8 sps:$4 sm:$0xff]   ;;  %v1067_v33 = vld [vmem:[#allocation2 + $0x70] ss:$8 sps:$4 sm:$0xff]   ;;  %v1068_v34 = vld [vmem:[#allocation2 + $0x84] ss:$8 sps:$4 sm:$0xff]  }
  0x31   :  { %v1070_v35 = vld [vmem:[#allocation2 + $0x80] ss:$8 sps:$4 sm:$0xff]   ;;  %v1071_v36 = vld [vmem:[#allocation2 + $0x94] ss:$8 sps:$4 sm:$0xff]   ;;  %v1073_v37 = vld [vmem:[#allocation2 + $0x90] ss:$8 sps:$4 sm:$0xff]  }
  0x32   :  { %v1074_v38 = vld [vmem:[#allocation2 + $0xa4] ss:$8 sps:$4 sm:$0xff]   ;;  %v1076_v39 = vld [vmem:[#allocation2 + $0xa0] ss:$8 sps:$4 sm:$0xff]   ;;  %v1077_v40 = vld [vmem:[#allocation2 + $0xb4] ss:$8 sps:$4 sm:$0xff]  }
  0x33   :  { %177 = vmatpush1.bf16.msra.mxu0 %v1031_v8  ;;  %424 = vmatpush1.bf16.msra.mxu1 %v1052_v18  ;;  %v1079_v41 = vld [vmem:[#allocation2 + $0xb0] ss:$8 sps:$4 sm:$0xff]   ;;  %v1080_v42 = vld [vmem:[#allocation2 + $0xc4] ss:$8 sps:$4 sm:$0xff]   ;;  %v1082_v43 = vld [vmem:[#allocation2 + $0xc0] ss:$8 sps:$4 sm:$0xff]  }
  0x34   :  { %178 = vmatprep.subr.bf16.mxu0 %v1032_v9  ;;  %425 = vmatprep.subr.bf16.mxu1 %v1053_v19  ;;  %v1083_v44 = vld [vmem:[#allocation2 + $0xd4] ss:$8 sps:$4 sm:$0xff]   ;;  %v1085_v45 = vld [vmem:[#allocation2 + $0xd0] ss:$8 sps:$4 sm:$0xff]   ;;  %v1086_v46 = vld [vmem:[#allocation2 + $0xe4] ss:$8 sps:$4 sm:$0xff]  }
  0x35   :  { %v1088_v47 = vld [vmem:[#allocation2 + $0xe0] ss:$8 sps:$4 sm:$0xff]   ;;  %v1089_v48 = vld [vmem:[#allocation2 + $0xf4] ss:$8 sps:$4 sm:$0xff]   ;;  %v1091_v49 = vld [vmem:[#allocation2 + $0xf0] ss:$8 sps:$4 sm:$0xff]  }
  0x36   :  { %v1092_v50 = vld [vmem:[#allocation4] ss:$8 sps:$4 sm:$0xff]   ;;  %v1094_v51 = vld [vmem:[#allocation4 + $0x4] ss:$8 sps:$4 sm:$0xff]   ;;  %v1097_v52 = vld [vmem:[#allocation4 + $0x14] ss:$8 sps:$4 sm:$0xff]  }
  0x37   :  { %179 = vmatpush1.bf16.msra.mxu0 %v1034_v13  ;;  %426 = vmatpush1.bf16.msra.mxu1 %v1055_v22  ;;  %v1095_v53 = vld [vmem:[#allocation4 + $0x10] ss:$8 sps:$4 sm:$0xff]   ;;  %v1100_v54 = vld [vmem:[#allocation4 + $0x24] ss:$8 sps:$4 sm:$0xff]   ;;  %v1098_v55 = vld [vmem:[#allocation4 + $0x20] ss:$8 sps:$4 sm:$0xff]  }
  0x38   :  { %180 = vmatprep.subr.bf16.mxu0 %v1035_v16  ;;  %427 = vmatprep.subr.bf16.mxu1 %v1056_v23  ;;  %v1103_v56 = vld [vmem:[#allocation4 + $0x34] ss:$8 sps:$4 sm:$0xff]   ;;  %v1101_v57 = vld [vmem:[#allocation4 + $0x30] ss:$8 sps:$4 sm:$0xff]   ;;  %v1106_v58 = vld [vmem:[#allocation4 + $0x44] ss:$8 sps:$4 sm:$0xff]  }
  0x39   :  { %v1104_v59 = vld [vmem:[#allocation4 + $0x40] ss:$8 sps:$4 sm:$0xff]   ;;  %v1109_v60 = vld [vmem:[#allocation4 + $0x54] ss:$8 sps:$4 sm:$0xff]   ;;  %v1107_v61 = vld [vmem:[#allocation4 + $0x50] ss:$8 sps:$4 sm:$0xff]  }
  0x3a   :  { %v1112_v62 = vld [vmem:[#allocation4 + $0x64] ss:$8 sps:$4 sm:$0xff]   ;;  %v1110_v63 = vld [vmem:[#allocation4 + $0x60] ss:$8 sps:$4 sm:$0xff]   ;;  %v1115_v0 = vld [vmem:[#allocation4 + $0x74] ss:$8 sps:$4 sm:$0xff]  }
  0x3b   :  { %181 = vmatpush1.bf16.msra.mxu0 %v1037_v17  ;;  %428 = vmatpush1.bf16.msra.mxu1 %v1058_v26  ;;  %v1113_v1 = vld [vmem:[#allocation4 + $0x70] ss:$8 sps:$4 sm:$0xff]   ;;  %v1118_v2 = vld [vmem:[#allocation4 + $0x84] ss:$8 sps:$4 sm:$0xff]   ;;  %v1116_v3 = vld [vmem:[#allocation4 + $0x80] ss:$8 sps:$4 sm:$0xff]  }
  0x3c   :  { %182 = vmatprep.subr.bf16.mxu0 %v1038_v20  ;;  %429 = vmatprep.subr.bf16.mxu1 %v1059_v27  ;;  %v1121_v4 = vld [vmem:[#allocation4 + $0x94] ss:$8 sps:$4 sm:$0xff]   ;;  %v1119_v5 = vld [vmem:[#allocation4 + $0x90] ss:$8 sps:$4 sm:$0xff]   ;;  %v1124_v6 = vld [vmem:[#allocation4 + $0xa4] ss:$8 sps:$4 sm:$0xff]  }
  0x3d   :  { %v1122_v7 = vld [vmem:[#allocation4 + $0xa0] ss:$8 sps:$4 sm:$0xff]   ;;  %v1127_v8 = vld [vmem:[#allocation4 + $0xb4] ss:$8 sps:$4 sm:$0xff]   ;;  %v1125_v9 = vld [vmem:[#allocation4 + $0xb0] ss:$8 sps:$4 sm:$0xff]  }
  0x3e   :  { %v1130_v10 = vld [vmem:[#allocation4 + $0xc4] ss:$8 sps:$4 sm:$0xff]   ;;  %v1128_v11 = vld [vmem:[#allocation4 + $0xc0] ss:$8 sps:$4 sm:$0xff]   ;;  %v1133_v12 = vld [vmem:[#allocation4 + $0xd4] ss:$8 sps:$4 sm:$0xff]  }
  0x3f   :  { %183 = vmatpush1.bf16.msra.mxu0 %v1040_v21  ;;  %430 = vmatpush1.bf16.msra.mxu1 %v1061_v29  ;;  %v1131_v13 = vld [vmem:[#allocation4 + $0xd0] ss:$8 sps:$4 sm:$0xff]   ;;  %v81_v15 = vshrl.u32 %v80_v14, 7  ;;  %v78_v17 = vld [vmem:[%s1409_s2] sm:$0x3] }
  0x40   :  { %184 = vmatprep.subr.bf16.mxu0 %v1041_v24  ;;  %431 = vmatprep.subr.bf16.mxu1 %v1062_v30  ;;  %v976_v14 = vld [vmem:[%s1415_s8] ss:$0 sm:$0xff] }
  0x41   :  { %v1334_v16 = vsub.s32 0, %v81_v15  ;;  %v1339_v18 = vsub.s32 1, %v81_v15 }
  0x43   :  { %185 = vmatpush1.bf16.msra.mxu0 %v1043_v25  ;;  %432 = vmatpush1.bf16.msra.mxu1 %v1064_v31  ;;  %v83_v19 = vrot.slane %v78_v17, %v1334_v16  ;;  %v87_v20 = vrot.slane %v78_v17, %v1339_v18  ;;  %v1136_v31 = vld [vmem:[#allocation4 + $0xe4] ss:$8 sps:$4 sm:$0xff]  }
  0x44   :  { %433 = vmatprep.subr.bf16.mxu1 %v1065_v32  ;;  %668 = vmatprep.subr.bf16.mxu0 %v1094_v51  ;;  %v1134_v32 = vld [vmem:[#allocation4 + $0xe0] ss:$8 sps:$4 sm:$0xff]  }
  0x46   :  { %203 = vmatmul.mubr.bf16.vlgmr.msra.gmra.mrb[0].mxu0 %v61_v28 }
  0x47   :  { %434 = vmatpush1.bf16.msra.mxu1 %v1067_v33  ;;  %669 = vmatpush1.bf16.msra.mxu0 %v1092_v50  ;;  %v1139_v33 = vld [vmem:[#allocation4 + $0xf4] ss:$8 sps:$4 sm:$0xff]  }
  0x48   :  { %435 = vmatprep.subr.bf16.mxu1 %v1068_v34  ;;  %670 = vmatprep.subr.bf16.mxu0 %v1097_v52  ;;  %v1137_v34 = vld [vmem:[#allocation4 + $0xf0] ss:$8 sps:$4 sm:$0xff]  }
  0x4b   :  { %436 = vmatpush1.bf16.msra.mxu1 %v1070_v35  ;;  %671 = vmatpush1.bf16.msra.mxu0 %v1095_v53  ;;  %v1140_v35 = vld [vmem:[%s1414_s7 + $0x40] sm:$0xff]  }
  0x4c   :  { %437 = vmatprep.subr.bf16.mxu1 %v1071_v36  ;;  %672 = vmatprep.subr.bf16.mxu0 %v1100_v54  ;;  %v1141_v36 = vld [vmem:[%s1414_s7] sm:$0xff]  }
  0x4f   :  { %438 = vmatpush1.bf16.msra.mxu1 %v1073_v37  ;;  %673 = vmatpush1.bf16.msra.mxu0 %v1098_v55  ;;  %v1142_v37 = vld [vmem:[%s1414_s7 + $0x48] sm:$0xff]  }
  0x50   :  { %439 = vmatprep.subr.bf16.mxu1 %v1074_v38  ;;  %674 = vmatprep.subr.bf16.mxu0 %v1103_v56  ;;  %v1143_v38 = vld [vmem:[%s1414_s7 + $0x8] sm:$0xff]  }
  0x53   :  { %440 = vmatpush1.bf16.msra.mxu1 %v1076_v39  ;;  %675 = vmatpush1.bf16.msra.mxu0 %v1101_v57  ;;  %v1144_v39 = vld [vmem:[%s1414_s7 + $0x50] sm:$0xff]  }
  0x54   :  { %441 = vmatprep.subr.bf16.mxu1 %v1077_v40  ;;  %676 = vmatprep.subr.bf16.mxu0 %v1106_v58  ;;  %v1145_v40 = vld [vmem:[%s1414_s7 + $0x10] sm:$0xff]  }
  0x57   :  { %442 = vmatpush1.bf16.msra.mxu1 %v1079_v41  ;;  %677 = vmatpush1.bf16.msra.mxu0 %v1104_v59  ;;  %v1146_v41 = vld [vmem:[%s1414_s7 + $0x58] sm:$0xff]  }
  0x58   :  { %443 = vmatprep.subr.bf16.mxu1 %v1080_v42  ;;  %678 = vmatprep.subr.bf16.mxu0 %v1109_v60  ;;  %v1147_v42 = vld [vmem:[%s1414_s7 + $0x18] sm:$0xff]   ;;  %v1152_v60 = vld [vmem:[%s1414_s7 + $0x70] sm:$0xff]  }
  0x5b   :  { %444 = vmatpush1.bf16.msra.mxu1 %v1082_v43  ;;  %679 = vmatpush1.bf16.msra.mxu0 %v1107_v61  ;;  %v1148_v43 = vld [vmem:[%s1414_s7 + $0x60] sm:$0xff]   ;;  %v1153_v61 = vld [vmem:[%s1414_s7 + $0x30] sm:$0xff]  }
  0x5c   :  { %445 = vmatprep.subr.bf16.mxu1 %v1083_v44  ;;  %680 = vmatprep.subr.bf16.mxu0 %v1112_v62  ;;  %v1149_v44 = vld [vmem:[%s1414_s7 + $0x20] sm:$0xff]   ;;  %v1154_v62 = vld [vmem:[%s1414_s7 + $0x78] sm:$0xff]  }
  0x5f   :  { %446 = vmatpush1.bf16.msra.mxu1 %v1085_v45  ;;  %681 = vmatpush1.bf16.msra.mxu0 %v1110_v63  ;;  %v1150_v45 = vld [vmem:[%s1414_s7 + $0x68] sm:$0xff]   ;;  %v1155_v63 = vld [vmem:[%s1414_s7 + $0x38] sm:$0xff]  }
  0x60   :  { %447 = vmatprep.subr.bf16.mxu1 %v1086_v46  ;;  %682 = vmatprep.subr.bf16.mxu0 %v1115_v0  ;;  %v1151_v46 = vld [vmem:[%s1414_s7 + $0x28] sm:$0xff]   ;;  %v496_v0 = vld [vmem:[%s1413_s6] sm:$0x3] }
  0x63   :  { %448 = vmatpush1.bf16.msra.mxu1 %v1088_v47  ;;  %683 = vmatpush1.bf16.msra.mxu0 %v1113_v1  ;;  %v247_v47 = vld [vmem:[%s1411_s4] sm:$0x3]  ;;  %v501_v1 = vrot.slane %v496_v0, %v1334_v16 }
  0x64   :  { %449 = vmatprep.subr.bf16.mxu1 %v1089_v48  ;;  %684 = vmatprep.subr.bf16.mxu0 %v1118_v2  ;;  %v252_v48 = vrot.slane %v247_v47, %v1334_v16  ;;  %v505_v2 = vrot.slane %v496_v0, %v1339_v18 }
  0x67   :  { %450 = vmatpush1.bf16.msra.mxu1 %v1091_v49  ;;  %685 = vmatpush1.bf16.msra.mxu0 %v1116_v3  ;;  %v256_v49 = vrot.slane %v247_v47, %v1339_v18 }
  0x68   :  { %686 = vmatprep.subr.bf16.mxu0 %v1121_v4  ;;  %993 = vmatprep.subr.bf16.mxu1 %v1140_v35 }
  0x6b   :  { %687 = vmatpush1.bf16.msra.mxu0 %v1119_v5 }
  0x6c   :  { %688 = vmatprep.subr.bf16.mxu0 %v1124_v6 }
  0x6f   :  { %689 = vmatpush1.bf16.msra.mxu0 %v1122_v7 }
  0x70   :  { %690 = vmatprep.subr.bf16.mxu0 %v1127_v8 }
  0x73   :  { %691 = vmatpush1.bf16.msra.mxu0 %v1125_v9 }
  0x74   :  { %692 = vmatprep.subr.bf16.mxu0 %v1130_v10 }
  0x77   :  { %693 = vmatpush1.bf16.msra.mxu0 %v1128_v11 }
  0x78   :  { %694 = vmatprep.subr.bf16.mxu0 %v1133_v12 }
  0x7b   :  { %695 = vmatpush1.bf16.msra.mxu0 %v1131_v13 }
  0x7c   :  { %696 = vmatprep.subr.bf16.mxu0 %v1136_v31 }
  0x7f   :  { %697 = vmatpush1.bf16.msra.mxu0 %v1134_v32 }
  0x80   :  { %698 = vmatprep.subr.bf16.mxu0 %v1139_v33 }
  0x83   :  { %699 = vmatpush1.bf16.msra.mxu0 %v1137_v34 }
 0x119   :  { %v204_v21 = vpop.f32.mrb[0].mxu0 }
 0x11a   :  { %v205_v22 = vadd.f32 %v204_v21, %v83_v19  ;;  %v206_v23 = vpop.f32.mrb[1].mxu0 }
 0x11b   :  { %v207_v24 = vadd.f32 %v206_v23, %v87_v20  ;;  %v208_v25 = vpop.f32.mrb[2].mxu0 }
 0x11c   :  { %v211_v26 = vmax.f32 %v205_v22, 0.0  ;;  %v209_v27 = vpop.f32.mrb[3].mxu0 }
 0x11d   :  { %v212_v28 = vmax.f32 %v207_v24, 0.0 }
 0x11e   :  { %v213_v30 = vpack.c.bf16 %v211_v26, %v211_v26 }
 0x11f   :  { %v214_v29 = vpack.c.bf16 %v212_v28, %v212_v28 }
 0x121   :  { %451 = vmatprep.mubr.bf16.mxu1 %v214_v29 }
 0x122   :  { %452 = vmatmul.mubr.bf16.vlgmr.msra.gmra.mrb[0].mxu1 %v213_v30 }
 0x123   :  { %994 = vmatpush3.bf16.msra.mxu1 %v1141_v36 }
 0x124   :  { %995 = vmatprep.subr.bf16.mxu1 %v1142_v37 }
 0x127   :  { %996 = vmatpush3.bf16.msra.mxu1 %v1143_v38 }
 0x128   :  { %997 = vmatprep.subr.bf16.mxu1 %v1144_v39 }
 0x12b   :  { %998 = vmatpush3.bf16.msra.mxu1 %v1145_v40 }
 0x12c   :  { %999 = vmatprep.subr.bf16.mxu1 %v1146_v41 }
 0x12f   :  { %1000 = vmatpush3.bf16.msra.mxu1 %v1147_v42 }
 0x130   :  { %1001 = vmatprep.subr.bf16.mxu1 %v1148_v43 }
 0x133   :  { %1002 = vmatpush3.bf16.msra.mxu1 %v1149_v44 }
 0x134   :  { %1003 = vmatprep.subr.bf16.mxu1 %v1150_v45 }
 0x137   :  { %1004 = vmatpush3.bf16.msra.mxu1 %v1151_v46 }
 0x138   :  { %1005 = vmatprep.subr.bf16.mxu1 %v1152_v60 }
 0x13b   :  { %1006 = vmatpush3.bf16.msra.mxu1 %v1153_v61 }
 0x13c   :  { %1007 = vmatprep.subr.bf16.mxu1 %v1154_v62 }
 0x13f   :  { %1008 = vmatpush3.bf16.msra.mxu1 %v1155_v63 }
 0x1f5   :  { %v453_v50 = vpop.f32.mrb[0].mxu1 }
 0x1f6   :  { %v454_v51 = vadd.f32 %v453_v50, %v252_v48  ;;  %v455_v52 = vpop.f32.mrb[1].mxu1 }
 0x1f7   :  { %v456_v53 = vadd.f32 %v455_v52, %v256_v49  ;;  %v457_v54 = vpop.f32.mrb[2].mxu1 }
 0x1f8   :  { %v460_v55 = vmax.f32 %v454_v51, 0.0  ;;  %v458_v56 = vpop.f32.mrb[3].mxu1 }
 0x1f9   :  { %v461_v57 = vmax.f32 %v456_v53, 0.0 }
 0x1fa   :  { %v462_v59 = vpack.c.bf16 %v460_v55, %v460_v55 }
 0x1fb   :  { %v463_v58 = vpack.c.bf16 %v461_v57, %v461_v57 }
 0x1fd   :  { %700 = vmatprep.mubr.bf16.mxu0 %v463_v58 }
 0x1fe   :  { %701 = vmatmul.mubr.bf16.vlgmr.msra.gmra.mrb[4].mxu0 %v462_v59 }
 0x2d1   :  { %v702_v3 = vpop.f32.mrb[4].mxu0 }
 0x2d2   :  { %v703_v4 = vadd.f32 %v702_v3, %v501_v1  ;;  %v704_v5 = vpop.f32.mrb[5].mxu0 }
 0x2d3   :  { %v705_v6 = vadd.f32 %v704_v5, %v505_v2  ;;  %v706_v7 = vpop.f32.mrb[6].mxu0 }
 0x2d4   :  { %v709_v8 = vmax.f32 %v703_v4, 0.0  ;;  %v707_v9 = vpop.f32.mrb[7].mxu0 }
 0x2d5   :  { %v710_v10 = vmax.f32 %v705_v6, 0.0 }
 0x2d6   :  { %v711_v12 = vpack.c.bf16 %v709_v8, %v709_v8 }
 0x2d7   :  { %v712_v11 = vpack.c.bf16 %v710_v10, %v710_v10 }
 0x2d9   :  { %880 = vmatprep.mubr.bf16.mxu1 %v712_v11 }
 0x2da   :  { %881 = vmatmul.mubr.bf16.vlgmr.msra.gmra.mrb[4].mxu1 %v711_v12 }
 0x3ad   :  { %v1009_v13 = vpop.f32.mrb[4].mxu1 }
 0x3ae   :  { %v1010_v15 = vpop.f32.mrb[5].mxu1 }
 0x3af   :  { %v1011_v16 = vadd.f32 %v1010_v15, %v1009_v13  ;;  %v1012_v17 = vpop.f32.mrb[6].mxu1 }
 0x3b0   :  { %v1013_v18 = vpop.f32.mrb[7].mxu1 }
 0x3b1   :  { %v883_v19 = vadd.f32 %v1011_v16, %v976_v14 }
 0x3b3   :  { %889 = vst.msk [vmem:[%s1416_s9] sm:$0xff] %vm888_vm0, %v883_v19 }
 0x3b4   :  { %894 = vsyncpa [#allocation3], 1 }
 0x3b5   :  { %895 = vsyncpa [#allocation5], 1 }

</bundles_post_ra>
